<compile_context>
chip_gen: v7x
topology: tpu7x:2x2x1
jax: 0.10.0
libtpu: 0.0.40
codegen_flags: <defaults>
</compile_context>

<pallas_src>
import functools

import jax
import jax.numpy as jnp
from jax.experimental import pallas as pl
from jax.experimental.pallas import tpu as pltpu


# ----------------------------------------------------------------------------
# Fused kernel: entire MLP forward for one batch tile
# ----------------------------------------------------------------------------
def _mlp_fused_kernel(*refs, n_layers, act, thres):
    """Fused forward pass of the whole MLP on one (TB, inp_dim) batch tile.

    refs = (x, w_t0, b0, w_t1, b1, ..., w_t{L-1}, b{L-1}, out, mask)
      x     : (TB, inp_dim)           f32 VMEM
      w_t_l : (in_l, out_l)           f32/bf16 VMEM (pre-transposed weight)
      b_l   : (1, out_l)              f32 VMEM
      out   : (TB, out_dim)           f32 VMEM (final Linear, no activation)
      mask  : (TB, sum(hidden dims))  i32 VMEM; mask[:, l*W:(l+1)*W] = act_l > thres
    """
    x_ref = refs[0]
    out_ref = refs[1 + 2 * n_layers]
    mask_ref = refs[2 + 2 * n_layers]

    x = x_ref[...]
    col = 0
    for l in range(n_layers):
        w_ref = refs[1 + 2 * l]
        b_ref = refs[2 + 2 * l]
        # Feed the MXU operands of the weight's dtype (bf16 when mxu_bf16 is
        # enabled in the wrapper); accumulate in f32, bias add in f32.
        lhs = x if x.dtype == w_ref.dtype else x.astype(w_ref.dtype)
        z = jnp.dot(lhs, w_ref[...], preferred_element_type=jnp.float32) + b_ref[...]
        if l == n_layers - 1:
            out_ref[...] = z.astype(out_ref.dtype)
        else:
            if act == "relu":
                a = jnp.maximum(z, 0.0)
            elif act == "tanh":
                a = jnp.tanh(z)
            elif act == "sigmoid":
                a = jax.nn.sigmoid(z)
            else:
                raise ValueError(f"unsupported act_func: {act}")
            width = a.shape[1]
            # Static lane-offset slice store into the single fused mask buffer
            # (no external concatenate, no external dtype convert).
            mask_ref[:, col:col + width] = (a > thres).astype(mask_ref.dtype)
            col += width
            x = a


# ----------------------------------------------------------------------------
# Wrapper: one pallas_call, 1-D batch grid, weights resident in VMEM
# ----------------------------------------------------------------------------
def network_forward(x, params, *, act_func="relu", thres=0.0,
                    batch_tile=512, mxu_bf16=False):
    """Mirrors Network.forward (use_bn=False, drop_out_rate=None).

    Returns (out, act_mask) where act_mask is the feature-axis concat of the
    per-hidden-layer (activation > thres) indicators as int32 (1/0).  The
    int32 dtype is returned unchanged to avoid an extra convert fusion on the
    hot path (reviewer's recommendation); consumers may treat nonzero as True.
    """
    # TODO(synk): the `x.view(-1, 784)` branch for >2-D (MNIST) inputs is not
    # exercised here; inputs are already 2-D.
    n_layers = len(params)
    B, inp_dim = x.shape
    out_dim = params[-1][0].shape[1]
    mask_dim = sum(w_t.shape[1] for w_t, _ in params[:-1])

    # Batch tiling: whole batch in one block when small; 512-row tiles with a
    # parallel grid axis (megacore-shardable) when large.  Partial final tiles
    # are handled by Pallas (out-of-range rows are never written back).
    tb = min(B, batch_tile)
    grid = (pl.cdiv(B, tb),)

    flat_inputs = [x]
    in_specs = [pl.BlockSpec((tb, inp_dim), lambda i: (i, 0))]
    for w_t, b in params:
        if mxu_bf16:
            w_t = w_t.astype(jnp.bfloat16)
        b2 = b.reshape(1, -1).astype(jnp.float32)  # (1, N): broadcasts over rows
        flat_inputs.append(w_t)
        flat_inputs.append(b2)
        # Constant index_map -> block never changes across the batch grid, so
        # the pipeline keeps these ~50 KB of parameters resident in VMEM.
        in_specs.append(pl.BlockSpec(tuple(w_t.shape), lambda i: (0, 0)))
        in_specs.append(pl.BlockSpec(tuple(b2.shape), lambda i: (0, 0)))

    kernel = functools.partial(
        _mlp_fused_kernel, n_layers=n_layers, act=act_func, thres=float(thres)
    )

    out, mask_i32 = pl.pallas_call(
        kernel,
        grid=grid,
        in_specs=in_specs,
        out_specs=(
            pl.BlockSpec((tb, out_dim), lambda i: (i, 0)),
            pl.BlockSpec((tb, mask_dim), lambda i: (i, 0)),
        ),
        out_shape=(
            jax.ShapeDtypeStruct((B, out_dim), jnp.float32),
            jax.ShapeDtypeStruct((B, mask_dim), jnp.int32),
        ),
        compiler_params=pltpu.CompilerParams(
            dimension_semantics=("parallel",),
            # Explicit budget: well under v7x's 64 MiB physical VMEM and above
            # v5e's 16 MiB default scoped limit, leaving headroom for bigger
            # batch tiles.  Per-step usage at tb=512 is ~1 MiB double-buffered.
            vmem_limit_bytes=32 * 1024 * 1024,
        ),
    )(*flat_inputs)

    return out, mask_i32


# ----------------------------------------------------------------------------
# Network: parameter construction (mirrors nn.Linear shapes)
# ----------------------------------------------------------------------------
def init_network_params(key, inp_dim, out_dim, depth, width):
    """Returns list of (w_t, b) with w_t = W.T of shape (in, out)."""
    dims = [inp_dim] + [width] * depth + [out_dim]
    params = []
    for i in range(len(dims) - 1):
        fan_in, fan_out = dims[i], dims[i + 1]
        key, kw, kb = jax.random.split(key, 3)
        bound = 1.0 / jnp.sqrt(fan_in)
        w = jax.random.uniform(kw, (fan_out, fan_in), jnp.float32, -bound, bound)
        b = jax.random.uniform(kb, (fan_out,), jnp.float32, -bound, bound)
        params.append((w.T, b))  # pre-transpose to (in, out) for the kernel
    return params


# ----------------------------------------------------------------------------
# Main
# ----------------------------------------------------------------------------
if __name__ == "__main__":
    INP_DIM, OUT_DIM, DEPTH, WIDTH = 32, 8, 3, 64
    BATCH = 16
    ACT, THRES = "relu", 0.0

    key = jax.random.PRNGKey(0)
    key, kx = jax.random.split(key)
    x = jax.random.normal(kx, (BATCH, INP_DIM), dtype=jnp.float32)

    params = init_network_params(key, INP_DIM, OUT_DIM, DEPTH, WIDTH)

    fwd = jax.jit(functools.partial(network_forward, act_func=ACT, thres=THRES))
    out, act_mask = fwd(x, params)
    jax.block_until_ready((out, act_mask))

    # Pure-JAX reference check.
    def ref_forward(x, params):
        masks = []
        for idx, (w_t, b) in enumerate(params):
            if idx == len(params) - 1:
                x = x @ w_t + b
            else:
                x = jnp.maximum(x @ w_t + b, 0.0)
                masks.append(x > THRES)
        return x, jnp.concatenate(masks, axis=1)

    ref_out, ref_mask = ref_forward(x, params)
    assert out.shape == (BATCH, OUT_DIM)
    assert act_mask.shape == (BATCH, DEPTH * WIDTH)
    assert act_mask.dtype == jnp.int32        # returned unconverted by design
    assert jnp.allclose(out, ref_out, atol=1e-4, rtol=1e-4)
    assert bool(jnp.all(act_mask == ref_mask.astype(jnp.int32)))  # test-only cast

    print("KERNEL_OK")
</pallas_src>

<mosaic_0001>
module attributes {stable_mosaic.version = 11 : i64} {
  func.func @_mlp_fused_kernel(%arg0: i32, %arg1: memref<16x32xf32, #tpu.memory_space<vmem>>, %arg2: memref<32x64xf32, #tpu.memory_space<vmem>>, %arg3: memref<1x64xf32, #tpu.memory_space<vmem>>, %arg4: memref<64x64xf32, #tpu.memory_space<vmem>>, %arg5: memref<1x64xf32, #tpu.memory_space<vmem>>, %arg6: memref<64x64xf32, #tpu.memory_space<vmem>>, %arg7: memref<1x64xf32, #tpu.memory_space<vmem>>, %arg8: memref<64x8xf32, #tpu.memory_space<vmem>>, %arg9: memref<1x8xf32, #tpu.memory_space<vmem>>, %arg10: memref<16x8xf32, #tpu.memory_space<vmem>>, %arg11: memref<16x192xi32, #tpu.memory_space<vmem>>) attributes {dimension_semantics = [#tpu.dimension_semantics<parallel>], iteration_bounds = array<i64: 1>, scalar_prefetch = 0 : i64, scratch_operands = 0 : i64, tpu.core_type = #tpu.core_type<tc>, window_params = [{transform_indices = @transform_0, window_bounds = array<i64: 16, 32>}, {pipeline_mode = #tpu.pipeline_mode<synchronous>, transform_indices = @transform_1, window_bounds = array<i64: 32, 64>}, {pipeline_mode = #tpu.pipeline_mode<synchronous>, transform_indices = @transform_2, window_bounds = array<i64: 1, 64>}, {pipeline_mode = #tpu.pipeline_mode<synchronous>, transform_indices = @transform_3, window_bounds = array<i64: 64, 64>}, {pipeline_mode = #tpu.pipeline_mode<synchronous>, transform_indices = @transform_4, window_bounds = array<i64: 1, 64>}, {pipeline_mode = #tpu.pipeline_mode<synchronous>, transform_indices = @transform_5, window_bounds = array<i64: 64, 64>}, {pipeline_mode = #tpu.pipeline_mode<synchronous>, transform_indices = @transform_6, window_bounds = array<i64: 1, 64>}, {pipeline_mode = #tpu.pipeline_mode<synchronous>, transform_indices = @transform_7, window_bounds = array<i64: 64, 8>}, {pipeline_mode = #tpu.pipeline_mode<synchronous>, transform_indices = @transform_8, window_bounds = array<i64: 1, 8>}, {transform_indices = @transform_9, window_bounds = array<i64: 16, 8>}, {transform_indices = @transform_10, window_bounds = array<i64: 16, 192>}]} {
    %c0 = arith.constant 0 : index
    %c0_0 = arith.constant 0 : index
    %0 = vector.load %arg1[%c0, %c0_0] : memref<16x32xf32, #tpu.memory_space<vmem>>, vector<16x32xf32>
    %c0_1 = arith.constant 0 : index
    %c0_2 = arith.constant 0 : index
    %1 = vector.load %arg2[%c0_1, %c0_2] : memref<32x64xf32, #tpu.memory_space<vmem>>, vector<32x64xf32>
    %cst = arith.constant dense<0.000000e+00> : vector<16x64xf32>
    %2 = tpu.matmul %0, %1, %cst {dimension_numbers = #tpu.dot_dimension_numbers<[1], [0], [0], [1], [0, 0, 1, 1], [], []>} : vector<16x32xf32>, vector<32x64xf32>, vector<16x64xf32> -> vector<16x64xf32>
    %c0_3 = arith.constant 0 : index
    %c0_4 = arith.constant 0 : index
    %3 = vector.load %arg3[%c0_3, %c0_4] : memref<1x64xf32, #tpu.memory_space<vmem>>, vector<1x64xf32>
    %4 = vector.broadcast %3 : vector<1x64xf32> to vector<16x64xf32>
    %5 = arith.addf %2, %4 : vector<16x64xf32>
    %cst_5 = arith.constant 0.000000e+00 : f32
    %6 = vector.broadcast %cst_5 : f32 to vector<16x64xf32>
    %7 = arith.maximumf %5, %6 : vector<16x64xf32>
    %cst_6 = arith.constant 0.000000e+00 : f32
    %8 = vector.broadcast %cst_6 : f32 to vector<16x64xf32>
    %9 = arith.cmpf ogt, %7, %8 : vector<16x64xf32>
    %10 = arith.extui %9 : vector<16x64xi1> to vector<16x64xi32>
    %c0_7 = arith.constant 0 : index
    %c0_8 = arith.constant 0 : index
    %11 = vector.load %arg11[%c0_7, %c0_8] : memref<16x192xi32, #tpu.memory_space<vmem>>, vector<16x64xi32>
    tpu.vector_store %arg11[%c0_7, %c0_8], %10 {strides = array<i32>} : memref<16x192xi32, #tpu.memory_space<vmem>>, vector<16x64xi32>,
    %c0_9 = arith.constant 0 : index
    %c0_10 = arith.constant 0 : index
    %12 = vector.load %arg4[%c0_9, %c0_10] : memref<64x64xf32, #tpu.memory_space<vmem>>, vector<64x64xf32>
    %cst_11 = arith.constant dense<0.000000e+00> : vector<16x64xf32>
    %13 = tpu.matmul %7, %12, %cst_11 {dimension_numbers = #tpu.dot_dimension_numbers<[1], [0], [0], [1], [0, 0, 1, 1], [], []>} : vector<16x64xf32>, vector<64x64xf32>, vector<16x64xf32> -> vector<16x64xf32>
    %c0_12 = arith.constant 0 : index
    %c0_13 = arith.constant 0 : index
    %14 = vector.load %arg5[%c0_12, %c0_13] : memref<1x64xf32, #tpu.memory_space<vmem>>, vector<1x64xf32>
    %15 = vector.broadcast %14 : vector<1x64xf32> to vector<16x64xf32>
    %16 = arith.addf %13, %15 : vector<16x64xf32>
    %cst_14 = arith.constant 0.000000e+00 : f32
    %17 = vector.broadcast %cst_14 : f32 to vector<16x64xf32>
    %18 = arith.maximumf %16, %17 : vector<16x64xf32>
    %cst_15 = arith.constant 0.000000e+00 : f32
    %19 = vector.broadcast %cst_15 : f32 to vector<16x64xf32>
    %20 = arith.cmpf ogt, %18, %19 : vector<16x64xf32>
    %21 = arith.extui %20 : vector<16x64xi1> to vector<16x64xi32>
    %c0_16 = arith.constant 0 : index
    %c64 = arith.constant 64 : index
    %22 = vector.load %arg11[%c0_16, %c64] : memref<16x192xi32, #tpu.memory_space<vmem>>, vector<16x64xi32>
    tpu.vector_store %arg11[%c0_16, %c64], %21 {strides = array<i32>} : memref<16x192xi32, #tpu.memory_space<vmem>>, vector<16x64xi32>,
    %c0_17 = arith.constant 0 : index
    %c0_18 = arith.constant 0 : index
    %23 = vector.load %arg6[%c0_17, %c0_18] : memref<64x64xf32, #tpu.memory_space<vmem>>, vector<64x64xf32>
    %cst_19 = arith.constant dense<0.000000e+00> : vector<16x64xf32>
    %24 = tpu.matmul %18, %23, %cst_19 {dimension_numbers = #tpu.dot_dimension_numbers<[1], [0], [0], [1], [0, 0, 1, 1], [], []>} : vector<16x64xf32>, vector<64x64xf32>, vector<16x64xf32> -> vector<16x64xf32>
    %c0_20 = arith.constant 0 : index
    %c0_21 = arith.constant 0 : index
    %25 = vector.load %arg7[%c0_20, %c0_21] : memref<1x64xf32, #tpu.memory_space<vmem>>, vector<1x64xf32>
    %26 = vector.broadcast %25 : vector<1x64xf32> to vector<16x64xf32>
    %27 = arith.addf %24, %26 : vector<16x64xf32>
    %cst_22 = arith.constant 0.000000e+00 : f32
    %28 = vector.broadcast %cst_22 : f32 to vector<16x64xf32>
    %29 = arith.maximumf %27, %28 : vector<16x64xf32>
    %cst_23 = arith.constant 0.000000e+00 : f32
    %30 = vector.broadcast %cst_23 : f32 to vector<16x64xf32>
    %31 = arith.cmpf ogt, %29, %30 : vector<16x64xf32>
    %32 = arith.extui %31 : vector<16x64xi1> to vector<16x64xi32>
    %c0_24 = arith.constant 0 : index
    %c128 = arith.constant 128 : index
    %33 = vector.load %arg11[%c0_24, %c128] : memref<16x192xi32, #tpu.memory_space<vmem>>, vector<16x64xi32>
    tpu.vector_store %arg11[%c0_24, %c128], %32 {strides = array<i32>} : memref<16x192xi32, #tpu.memory_space<vmem>>, vector<16x64xi32>,
    %c0_25 = arith.constant 0 : index
    %c0_26 = arith.constant 0 : index
    %34 = vector.load %arg8[%c0_25, %c0_26] : memref<64x8xf32, #tpu.memory_space<vmem>>, vector<64x8xf32>
    %cst_27 = arith.constant dense<0.000000e+00> : vector<16x8xf32>
    %35 = tpu.matmul %29, %34, %cst_27 {dimension_numbers = #tpu.dot_dimension_numbers<[1], [0], [0], [1], [0, 0, 1, 1], [], []>} : vector<16x64xf32>, vector<64x8xf32>, vector<16x8xf32> -> vector<16x8xf32>
    %c0_28 = arith.constant 0 : index
    %c0_29 = arith.constant 0 : index
    %36 = vector.load %arg9[%c0_28, %c0_29] : memref<1x8xf32, #tpu.memory_space<vmem>>, vector<1x8xf32>
    %37 = vector.broadcast %36 : vector<1x8xf32> to vector<16x8xf32>
    %38 = arith.addf %35, %37 : vector<16x8xf32>
    %c0_30 = arith.constant 0 : index
    %c0_31 = arith.constant 0 : index
    %39 = vector.load %arg10[%c0_30, %c0_31] : memref<16x8xf32, #tpu.memory_space<vmem>>, vector<16x8xf32>
    tpu.vector_store %arg10[%c0_30, %c0_31], %38 {strides = array<i32>} : memref<16x8xf32, #tpu.memory_space<vmem>>, vector<16x8xf32>,
    return
  }
  func.func @transform_0(%arg0: i32) -> (i32, i32) {
    %c0_i32 = arith.constant 0 : i32
    %c0_i32_0 = arith.constant 0 : i32
    return %arg0, %c0_i32 : i32, i32
  }
  func.func @transform_1(%arg0: i32) -> (i32, i32) {
    %c0_i32 = arith.constant 0 : i32
    %c0_i32_0 = arith.constant 0 : i32
    %c0_i32_1 = arith.constant 0 : i32
    return %c0_i32, %c0_i32_0 : i32, i32
  }
  func.func @transform_2(%arg0: i32) -> (i32, i32) {
    %c0_i32 = arith.constant 0 : i32
    %c0_i32_0 = arith.constant 0 : i32
    %c0_i32_1 = arith.constant 0 : i32
    return %c0_i32, %c0_i32_0 : i32, i32
  }
  func.func @transform_3(%arg0: i32) -> (i32, i32) {
    %c0_i32 = arith.constant 0 : i32
    %c0_i32_0 = arith.constant 0 : i32
    %c0_i32_1 = arith.constant 0 : i32
    return %c0_i32, %c0_i32_0 : i32, i32
  }
  func.func @transform_4(%arg0: i32) -> (i32, i32) {
    %c0_i32 = arith.constant 0 : i32
    %c0_i32_0 = arith.constant 0 : i32
    %c0_i32_1 = arith.constant 0 : i32
    return %c0_i32, %c0_i32_0 : i32, i32
  }
  func.func @transform_5(%arg0: i32) -> (i32, i32) {
    %c0_i32 = arith.constant 0 : i32
    %c0_i32_0 = arith.constant 0 : i32
    %c0_i32_1 = arith.constant 0 : i32
    return %c0_i32, %c0_i32_0 : i32, i32
  }
  func.func @transform_6(%arg0: i32) -> (i32, i32) {
    %c0_i32 = arith.constant 0 : i32
    %c0_i32_0 = arith.constant 0 : i32
    %c0_i32_1 = arith.constant 0 : i32
    return %c0_i32, %c0_i32_0 : i32, i32
  }
  func.func @transform_7(%arg0: i32) -> (i32, i32) {
    %c0_i32 = arith.constant 0 : i32
    %c0_i32_0 = arith.constant 0 : i32
    %c0_i32_1 = arith.constant 0 : i32
    return %c0_i32, %c0_i32_0 : i32, i32
  }
  func.func @transform_8(%arg0: i32) -> (i32, i32) {
    %c0_i32 = arith.constant 0 : i32
    %c0_i32_0 = arith.constant 0 : i32
    %c0_i32_1 = arith.constant 0 : i32
    return %c0_i32, %c0_i32_0 : i32, i32
  }
  func.func @transform_9(%arg0: i32) -> (i32, i32) {
    %c0_i32 = arith.constant 0 : i32
    %c0_i32_0 = arith.constant 0 : i32
    return %arg0, %c0_i32 : i32, i32
  }
  func.func @transform_10(%arg0: i32) -> (i32, i32) {
    %c0_i32 = arith.constant 0 : i32
    %c0_i32_0 = arith.constant 0 : i32
    return %arg0, %c0_i32 : i32, i32
  }
}

</mosaic_0001>

<bundles_post_ra>
// kernel: network_forward.1
= control target key start
LH: loop header
LB: loop body
LE: loop exit
PB: predicated region body
PF: predicated region fallthrough
CT: control target
= control target key end

     0   :  { %16 = vsyncpa [#allocation3], 0  ;;  %s950_s0 = inlined_call_operand.hbm [shape: f32[16,32], index: 0, kind: input, shape index: {}]   ;;  %s951_s1 = inlined_call_operand.vmem [shape: f32[32,64], index: 1, kind: input, shape index: {}]   ;;  %s952_s2 = inlined_call_operand.vmem [shape: f32[1,64], index: 2, kind: input, shape index: {}]   ;;  %s953_s3 = inlined_call_operand.vmem [shape: f32[64,64], index: 3, kind: input, shape index: {}]   ;;  %s954_s4 = inlined_call_operand.vmem [shape: f32[1,64], index: 4, kind: input, shape index: {}]   ;;  %s955_s5 = inlined_call_operand.hbm [shape: f32[64,64], index: 5, kind: input, shape index: {}]   ;;  %s956_s6 = inlined_call_operand.vmem [shape: f32[1,64], index: 6, kind: input, shape index: {}]   ;;  %s957_s7 = inlined_call_operand.vmem [shape: f32[64,8], index: 7, kind: input, shape index: {}]   ;;  %s958_s8 = inlined_call_operand.vmem [shape: f32[1,8], index: 8, kind: input, shape index: {}]   ;;  %s959_s9 = inlined_call_operand.vmem [shape: f32[16,8], index: 9, kind: output, shape index: {0}]   ;;  %s960_s10 = inlined_call_operand.hbm [shape: s32[16,192], index: 10, kind: output, shape index: {1}]  }
   0x1   :  { %17 = vsyncpa [#allocation6], 0 }
   0x2   :  { %18 = vsyncpa [#allocation4], 0  ;;  %s754_s13 = smov [#allocation2]   ;;  %s682_s17 = scalar_lea.hbm %s950_s0, 256 }
   0x3   :  { %s24_s14 = sshll.u32 %s754_s13, 4  ;;  %p683_p0 = scmp.ne.s32.totalorder %s950_s0, %s682_s17  ;;  %s25_s14 = int_to_ptr.vmem [resolvable:$true] %s24_s14 }
   0x4   :  { %p686_p1 = scmp.lt.u32.totalorder %s682_s17, %s950_s0 }
   0x6   :  { %p688_p2 = pnand %p686_p1, %p683_p0 }
   0x8   :  { %691 = shalt.err (!%p688_p2)
}
   0x9   :  { %s692_s22 = scalar_lea.vmem %s25_s14, 256  ;;  %p697_p4 = scmp.lt.s32.totalorder %s25_s14, %s25_s14 }
   0xa   :  { %p693_p3 = scmp.ne.s32.totalorder %s25_s14, %s692_s22  ;;  %p698_p5 = scmp.lt.s32.totalorder %s692_s22, %s692_s22 }
   0xc   :  { %p699_p6 = por %p698_p5, %p697_p4 }
   0xe   :  { %p700_p7 = pnand %p699_p6, %p693_p3 }
  0x10   :  { %703 = shalt.err (!%p700_p7)
}
  0x11   :  { %s755_s23 = smov 128   ;;  %s756_s24 = smov 8  }
  0x12   :  { %30 = dma.hbm_to_vmem [thread:$0]  %s950_s0, 256, %s25_s14, [#allocation3], %s755_s23, %s755_s23, %s756_s24  }
  0x13   :  { %s757_s27 = smov [#allocation5]   ;;  %s704_s11 = scalar_lea.hbm %s955_s5, 1024 }
  0x14   :  { %s44_s28 = sshll.u32 %s757_s27, 4  ;;  %p705_p8 = scmp.ne.s32.totalorder %s955_s5, %s704_s11  ;;  %s45_s28 = int_to_ptr.vmem [resolvable:$true] %s44_s28 }
  0x15   :  { %p708_p9 = scmp.lt.u32.totalorder %s704_s11, %s955_s5 }
  0x17   :  { %p710_p10 = pnand %p708_p9, %p705_p8 }
  0x19   :  { %713 = shalt.err (!%p710_p10)
}
  0x1a   :  { %s714_s17 = scalar_lea.vmem %s45_s28, 1024  ;;  %p719_p12 = scmp.lt.s32.totalorder %s45_s28, %s45_s28 }
  0x1b   :  { %p715_p11 = scmp.ne.s32.totalorder %s45_s28, %s714_s17  ;;  %p720_p13 = scmp.lt.s32.totalorder %s714_s17, %s714_s17 }
  0x1d   :  { %p721_p0 = por %p720_p13, %p719_p12 }
  0x1f   :  { %p722_p1 = pnand %p721_p0, %p715_p11 }
  0x21   :  { %725 = shalt.err (!%p722_p1)
}
  0x22   :  { %50 = dma.hbm_to_vmem [thread:$0]  %s955_s5, 1024, %s45_s28, [#allocation6], %s755_s23, %s755_s23, %s756_s24  }
  0x23   :  { %748 = dma.done.wait [#allocation3], 256  }
  0x24   :  { %749 = vsyncadd [#allocation3], 4294967040 }
  0x25   :  { %750 = dma.done.wait [#allocation6], 1024  }
  0x26   :  { %751 = vsyncadd [#allocation6], 4294966272  ;;  %vm76_vm0 = vcmask 261120   ;;  %v65_v0 = vld [vmem:[%s951_s1] sm:$0xff]  ;;  %v66_v1 = vld [vmem:[%s951_s1 + $0x8] sm:$0xff]  ;;  %vm164_vm1 = vcmask 523264  }
  0x27   :  { %v67_v2 = vld [vmem:[%s951_s1 + $0x10] sm:$0xff]  ;;  %v617_v3 = vpack.c.bf16 %v66_v1, %v65_v0  ;;  %v68_v4 = vld [vmem:[%s951_s1 + $0x18] sm:$0xff]  ;;  %v63_v5 = vld [vmem:[#allocation2] sm:$0xff]  ;;  %v758_v36 = vmov 0   ;;  %s759_s11 = smov 64   ;;  %vm273_vm6 = vcmask 1048064  }
  0x28   :  { %v621_v6 = vpack.c.bf16 %v68_v4, %v67_v2  ;;  %557 = vmatprep.mubr.msk.f32.mxu0 %vm76_vm0, %v63_v5  ;;  %v167_v7 = vld [vmem:[%s953_s3] sm:$0xff]  ;;  %v168_v8 = vld [vmem:[%s953_s3 + $0x8] sm:$0xff]  ;;  %v169_v9 = vld [vmem:[%s953_s3 + $0x10] sm:$0xff] }
  0x29   :  { %618 = vmatprep.subr.bf16.mxu0 %v617_v3  ;;  %v625_v10 = vpack.c.bf16 %v168_v8, %v167_v7  ;;  %v170_v11 = vld [vmem:[%s953_s3 + $0x18] sm:$0xff]  ;;  %v171_v13 = vld [vmem:[%s953_s3 + $0x20] sm:$0xff]  ;;  %v172_v14 = vld [vmem:[%s953_s3 + $0x28] sm:$0xff] }
  0x2a   :  { %620 = vmatpush3.bf16.msra.mxu0 %v617_v3  ;;  %v629_v12 = vpack.c.bf16 %v170_v11, %v169_v9  ;;  %v633_v15 = vpack.c.bf16 %v172_v14, %v171_v13  ;;  %v64_v16 = vld [vmem:[#allocation2 + $0x8] sm:$0xff]  ;;  %v173_v17 = vld [vmem:[%s953_s3 + $0x30] sm:$0xff]  ;;  %v174_v18 = vld [vmem:[%s953_s3 + $0x38] sm:$0xff] }
  0x2b   :  { %622 = vmatprep.subr.bf16.mxu0 %v621_v6  ;;  %626 = vmatprep.subr.bf16.mxu1 %v625_v10  ;;  %v637_v19 = vpack.c.bf16 %v174_v18, %v173_v17  ;;  %v276_v20 = vld [vmem:[#allocation5] sm:$0xff]  ;;  %v277_v21 = vld [vmem:[#allocation5 + $0x8] sm:$0xff]  ;;  %v278_v22 = vld [vmem:[#allocation5 + $0x10] sm:$0xff] }
  0x2c   :  { %628 = vmatpush3.bf16.msra.mxu1 %v625_v10  ;;  %v641_v23 = vpack.c.bf16 %v277_v21, %v276_v20  ;;  %v279_v24 = vld [vmem:[#allocation5 + $0x18] sm:$0xff]  ;;  %v280_v26 = vld [vmem:[#allocation5 + $0x20] sm:$0xff]  ;;  %v281_v27 = vld [vmem:[#allocation5 + $0x28] sm:$0xff] }
  0x2d   :  { %630 = vmatprep.subr.bf16.mxu1 %v629_v12  ;;  %v645_v25 = vpack.c.bf16 %v279_v24, %v278_v22  ;;  %v649_v28 = vpack.c.bf16 %v281_v27, %v280_v26  ;;  %v501_v29 = vld [vmem:[%s952_s2] ss:$0 sm:$0xff]  ;;  %v283_v40 = vld [vmem:[#allocation5 + $0x38] sm:$0xff]  ;;  %v382_v45 = vld [vmem:[%s957_s7 + $0x10] sm:$0xff] }
  0x2e   :  { %624 = vmatpush3.bf16.msra.mxu0 %v621_v6  ;;  %v282_v39 = vld [vmem:[#allocation5 + $0x30] sm:$0xff]  ;;  %v381_v44 = vld [vmem:[%s957_s7 + $0x8] sm:$0xff]  ;;  %v383_v48 = vld [vmem:[%s957_s7 + $0x18] sm:$0xff] }
  0x2f   :  { %642 = vmatprep.subr.bf16.mxu0 %v641_v23  ;;  %v653_v41 = vpack.c.bf16 %v283_v40, %v282_v39  ;;  %v504_v42 = vld [vmem:[%s954_s4] ss:$0 sm:$0xff]  ;;  %v661_v51 = vpack.c.bf16 %v383_v48, %v382_v45  ;;  %v385_v53 = vld [vmem:[%s957_s7 + $0x28] sm:$0xff]  ;;  %v386_v60 = vld [vmem:[%s957_s7 + $0x30] sm:$0xff] }
  0x30   :  { %632 = vmatpush3.bf16.msra.mxu1 %v629_v12  ;;  %v380_v43 = vld [vmem:[%s957_s7] sm:$0xff]  ;;  %v387_v61 = vld [vmem:[%s957_s7 + $0x38] sm:$0xff] }
  0x31   :  { %558 = vmatmul.mubr.msk.f32.vlgmr.msra.gmra.mrb[0].mxu0 %vm76_vm0, %v64_v16  ;;  %634 = vmatprep.subr.bf16.mxu1 %v633_v15  ;;  %v657_v47 = vpack.c.bf16 %v381_v44, %v380_v43  ;;  %v384_v52 = vld [vmem:[%s957_s7 + $0x20] sm:$0xff]  ;;  %v669_v62 = vpack.c.bf16 %v387_v61, %v386_v60 }
  0x32   :  { %644 = vmatpush3.bf16.msra.mxu0 %v641_v23  ;;  %v665_v57 = vpack.c.bf16 %v385_v53, %v384_v52  ;;  %v507_v1 = vld [vmem:[%s956_s6] ss:$0 sm:$0xff]  ;;  %s760_s6 = smov [#allocation7]  }
  0x33   :  { %646 = vmatprep.subr.bf16.mxu0 %v645_v25  ;;  %s486_s7 = sshll.u32 %s760_s6, 4  ;;  %s487_s7 = int_to_ptr.vmem [resolvable:$true] %s486_s7 }
  0x34   :  { %636 = vmatpush3.bf16.msra.mxu1 %v633_v15  ;;  %s726_s0 = scalar_lea.vmem %s487_s7, 512  ;;  %p731_p3 = scmp.lt.s32.totalorder %s487_s7, %s487_s7 }
  0x35   :  { %638 = vmatprep.subr.bf16.mxu1 %v637_v19  ;;  %p727_p2 = scmp.ne.s32.totalorder %s487_s7, %s726_s0  ;;  %p732_p4 = scmp.lt.s32.totalorder %s726_s0, %s726_s0 }
  0x36   :  { %648 = vmatpush3.bf16.msra.mxu0 %v645_v25 }
  0x37   :  { %650 = vmatprep.subr.bf16.mxu0 %v649_v28  ;;  %p733_p5 = por %p732_p4, %p731_p3 }
  0x38   :  { %640 = vmatpush3.bf16.msra.mxu1 %v637_v19 }
  0x39   :  { %658 = vmatprep.subr.bf16.mxu1 %v657_v47  ;;  %p734_p6 = pnand %p733_p5, %p727_p2 }
  0x3a   :  { %652 = vmatpush3.bf16.msra.mxu0 %v649_v28 }
  0x3b   :  { %654 = vmatprep.subr.bf16.mxu0 %v653_v41 }
  0x3e   :  { %656 = vmatpush3.bf16.msra.mxu0 %v653_v41 }
 0x104   :  { %v559_v30 = vpop.f32.mrb[0].mxu0 }
 0x105   :  { %v155_v31 = vadd.f32 %v559_v30, %v501_v29  ;;  %v149_v32 = vpop.f32.mrb[1].mxu0 }
 0x106   :  { %v150_v33 = vadd.f32 %v501_v29, %v149_v32 }
 0x107   :  { %v159_v34 = vmax.f32 %v155_v31, 0.0 }
 0x108   :  { %v158_v35 = vmax.f32 %v150_v33, 0.0 }
 0x109   :  { %vm161_vm2 = vcmp.gt.f32.partialorder %v159_v34, 0.0 }
 0x10a   :  { %v163_v37 = vsel %vm161_vm2, 1, %v758_v36  ;;  %vm160_vm3 = vcmp.gt.f32.partialorder %v158_v35, 0.0  ;;  %576 = vmatprep.mubr.msk.f32.mxu1 %vm164_vm1, %v158_v35 }
 0x10b   :  { %166 = vst.msk [vmem:[#allocation7 + $0x10] sm:$0xff] %vm164_vm1, %v163_v37  ;;  %v162_v38 = vsel %vm160_vm3, 1, %v758_v36  ;;  %577 = vmatmul.mubr.msk.f32.vlgmr.msra.gmra.mrb[0].mxu1 %vm164_vm1, %v159_v34 }
 0x10c   :  { %165 = vst.msk [vmem:[#allocation7] sm:$0xff] %vm164_vm1, %v162_v38  ;;  %660 = vmatpush3.bf16.msra.mxu1 %v657_v47 }
 0x10d   :  { %662 = vmatprep.subr.bf16.mxu1 %v661_v51 }
 0x110   :  { %664 = vmatpush3.bf16.msra.mxu1 %v661_v51 }
 0x111   :  { %666 = vmatprep.subr.bf16.mxu1 %v665_v57 }
 0x114   :  { %668 = vmatpush3.bf16.msra.mxu1 %v665_v57 }
 0x115   :  { %670 = vmatprep.subr.bf16.mxu1 %v669_v62 }
 0x118   :  { %672 = vmatpush3.bf16.msra.mxu1 %v669_v62 }
 0x1de   :  { %v578_v46 = vpop.f32.mrb[0].mxu1 }
 0x1df   :  { %v260_v49 = vadd.f32 %v578_v46, %v504_v42  ;;  %v254_v50 = vpop.f32.mrb[1].mxu1 }
 0x1e0   :  { %v255_v54 = vadd.f32 %v504_v42, %v254_v50 }
 0x1e1   :  { %v264_v55 = vmax.f32 %v260_v49, 0.0 }
 0x1e2   :  { %v263_v56 = vmax.f32 %v255_v54, 0.0 }
 0x1e3   :  { %vm266_vm5 = vcmp.gt.f32.partialorder %v264_v55, 0.0 }
 0x1e4   :  { %595 = vmatprep.mubr.msk.f32.mxu0 %vm164_vm1, %v263_v56  ;;  %vm265_vm4 = vcmp.gt.f32.partialorder %v263_v56, 0.0  ;;  %v268_v59 = vsel %vm266_vm5, 1, %v758_v36 }
 0x1e5   :  { %596 = vmatmul.mubr.msk.f32.vlgmr.msra.gmra.mrb[2].mxu0 %vm164_vm1, %v264_v55  ;;  %v267_v58 = vsel %vm265_vm4, 1, %v758_v36 }
 0x1e6   :  { %269 = vrot.lane.b32.xlu0 %v267_v58, %s759_s11 }
 0x1ea   :  { %271 = vrot.lane.b32.xlu0 %v268_v59, %s759_s11 }
 0x258   :  { %v270_v63 = vpop.permute.xlu0 %269 }
 0x259   :  { %274 = vst.msk [vmem:[#allocation7] sm:$0xff] %vm273_vm6, %v270_v63 }
 0x25c   :  { %v272_v0 = vpop.permute.xlu0 %271 }
 0x25d   :  { %275 = vst.msk [vmem:[#allocation7 + $0x10] sm:$0xff] %vm273_vm6, %v272_v0 }
 0x2b8   :  { %v597_v2 = vpop.f32.mrb[2].mxu0 }
 0x2b9   :  { %v369_v3 = vadd.f32 %v597_v2, %v507_v1  ;;  %v363_v4 = vpop.f32.mrb[3].mxu0 }
 0x2ba   :  { %v364_v5 = vadd.f32 %v507_v1, %v363_v4 }
 0x2bb   :  { %v373_v6 = vmax.f32 %v369_v3, 0.0 }
 0x2bc   :  { %v372_v7 = vmax.f32 %v364_v5, 0.0 }
 0x2bd   :  { %vm375_vm7 = vcmp.gt.f32.partialorder %v373_v6, 0.0 }
 0x2be   :  { %v377_v8 = vsel %vm375_vm7, 1, %v758_v36  ;;  %vm374_vm8 = vcmp.gt.f32.partialorder %v372_v7, 0.0  ;;  %614 = vmatprep.mubr.msk.f32.mxu1 %vm164_vm1, %v372_v7 }
 0x2bf   :  { %379 = vst.msk [vmem:[#allocation7 + $0x18] sm:$0xff] %vm164_vm1, %v377_v8  ;;  %v376_v9 = vsel %vm374_vm8, 1, %v758_v36  ;;  %615 = vmatmul.mubr.msk.f32.vlgmr.msra.gmra.mrb[2].mxu1 %vm164_vm1, %v373_v6 }
 0x2c0   :  { %378 = vst.msk [vmem:[#allocation7 + $0x8] sm:$0xff] %vm164_vm1, %v376_v9 }
 0x2c1   :  { %737 = shalt.err (!%p734_p6)
}
 0x2c2   :  { %s738_s19 = scalar_lea.hbm %s960_s10, 512 }
 0x2c3   :  { %p739_p7 = scmp.ne.s32.totalorder %s960_s10, %s738_s19  ;;  %p742_p8 = scmp.lt.u32.totalorder %s738_s19, %s960_s10 }
 0x2c5   :  { %p744_p9 = pnand %p742_p8, %p739_p7 }
 0x2c7   :  { %747 = shalt.err (!%p744_p9)
}
 0x2c8   :  { %s761_s22 = smov 256   ;;  %s762_s25 = smov 16   ;;  %v510_v10 = vld [vmem:[%s958_s8] ss:$0 sm:$0xff]  ;;  %vm476_vm9 = vcmask 64512  }
 0x2c9   :  { %492 = dma.vmem_to_hbm [thread:$0]  %s487_s7, 512, %s960_s10, [#allocation4], %s761_s22, %s761_s22, %s762_s25  }
 0x392   :  { %v616_v11 = vpop.f32.mrb[2].mxu1 }
 0x393   :  { %v473_v12 = vadd.f32 %v616_v11, %v510_v10  ;;  %v467_v13 = vpop.f32.mrb[3].mxu1 }
 0x394   :  { %v468_v14 = vadd.f32 %v510_v10, %v467_v13 }
 0x395   :  { %478 = vst.msk [vmem:[%s959_s9 + $0x8] sm:$0xff] %vm476_vm9, %v473_v12 }
 0x396   :  { %477 = vst.msk [vmem:[%s959_s9] sm:$0xff] %vm476_vm9, %v468_v14 }
 0x397   :  { %752 = dma.done.wait [#allocation4], 512  }
 0x398   :  { %753 = vsyncadd [#allocation4], 4294966784 }
 0x399   :  { %498 = vsyncpa [#allocation3], 1 }
 0x39a   :  { %499 = vsyncpa [#allocation6], 1 }
 0x39b   :  { %500 = vsyncpa [#allocation4], 1 }

</bundles_post_ra>
